<compile_context>
chip_gen: v7x
topology: tpu7x:2x2x1
jax: 0.10.0
libtpu: 0.0.40
codegen_flags: <defaults>
</compile_context>

<pallas_src>
import jax
import jax.numpy as jnp
from jax.experimental import pallas as pl
from jax.experimental.pallas import tpu as pltpu  # noqa: F401  (kept for parity)


def lstm_cell_kernel(xh_ref, c_ref, w_ref, bias_ref, scale_ref, offset_ref,
                     hc_out_ref):
    """Fused LSTMCell step. Gate order along 4H follows PyTorch: (i, f, g, o)."""
    xh = xh_ref[...].astype(jnp.float32)      # [B, I+H]
    c = c_ref[...].astype(jnp.float32)        # [B, H]

    # One fused MXU matmul: gates = [x, h] @ [W_ih^T ; W_hh^T] + (b_ih + b_hh)
    gates = jnp.dot(xh, w_ref[...], preferred_element_type=jnp.float32)
    gates = gates + bias_ref[...]             # [B, 4H], bias is [1, 4H]

    # One full-vreg tanh for all four gates:
    #   sigmoid(x) = 0.5*tanh(0.5*x) + 0.5   (i, f, o blocks: scale=0.5, off=0.5)
    #   tanh(x)    = 1.0*tanh(1.0*x) + 0.0   (g block:        scale=1.0, off=0.0)
    s = scale_ref[...]                        # [1, 4H]
    act = s * jnp.tanh(gates * s) + offset_ref[...]

    H = c.shape[-1]
    i_g = act[:, 0 * H:1 * H]
    f_g = act[:, 1 * H:2 * H]
    g_g = act[:, 2 * H:3 * H]
    o_g = act[:, 3 * H:4 * H]

    c_new = f_g * c + i_g * g_g
    h_new = o_g * jnp.tanh(c_new)

    # Single lane-dense [B, 2H] store: [h_new | c_new].
    hc_out_ref[...] = jnp.concatenate([h_new, c_new], axis=-1).astype(
        hc_out_ref.dtype)


def prepare_lstm_params(w_ih, w_hh, b_ih, b_hh):
    """One-time (outside the per-step jit) weight fusion / transpose / constants.

    w_ih: [4H, I], w_hh: [4H, H], b_ih/b_hh: [4H]  (PyTorch LSTMCell layout).
    Returns (w_fused [I+H, 4H], bias [1, 4H], scale [1, 4H], offset [1, 4H]).
    """
    H4 = w_ih.shape[0]
    H = H4 // 4
    w_fused = jnp.concatenate(
        [jnp.transpose(w_ih), jnp.transpose(w_hh)], axis=0
    ).astype(jnp.float32)                                 # [I+H, 4H]
    bias = (b_ih + b_hh).reshape(1, H4).astype(jnp.float32)

    ones = jnp.ones((1, H), jnp.float32)
    # per-gate-block (i, f, g, o) activation rewrite constants
    scale = jnp.concatenate([0.5 * ones, 0.5 * ones, 1.0 * ones, 0.5 * ones],
                            axis=1)
    offset = jnp.concatenate([0.5 * ones, 0.5 * ones, 0.0 * ones, 0.5 * ones],
                             axis=1)
    return w_fused, bias, scale, offset


def lstm_net_forward(x, h, c, w_fused, bias, scale, offset):
    """LSTMNet.forward(x, h, c) -> (h_out, c_out).  Dropout == identity (eval)."""
    B, I = x.shape
    H = h.shape[1]
    assert w_fused.shape == (I + H, 4 * H)

    # Fuse x and h so the kernel does a single [B, I+H] @ [I+H, 4H] matmul.
    xh = jnp.concatenate([x, h], axis=1).astype(jnp.float32)  # [B, I+H]
    c32 = c.astype(jnp.float32)

    full = lambda shape: pl.BlockSpec(shape, lambda: (0,) * len(shape))

    hc = pl.pallas_call(
        lstm_cell_kernel,
        out_shape=jax.ShapeDtypeStruct((B, 2 * H), x.dtype),
        grid=(),
        in_specs=[
            full((B, I + H)),      # xh
            full((B, H)),          # c
            full((I + H, 4 * H)),  # fused, pre-transposed weights
            full((1, 4 * H)),      # fused bias
            full((1, 4 * H)),      # activation scale
            full((1, 4 * H)),      # activation offset
        ],
        out_specs=full((B, 2 * H)),
    )(xh, c32, w_fused, bias, scale, offset)

    # Note: if this model is ever run in bf16, keep the cell state c in f32
    # across steps to avoid accumulating rounding error.
    return hc[:, :H], hc[:, H:]


def _reference(x, h, c, w_ih, w_hh, b_ih, b_hh):
    gates = x @ w_ih.T + b_ih + h @ w_hh.T + b_hh
    H = h.shape[1]
    i = jax.nn.sigmoid(gates[:, 0 * H:1 * H])
    f = jax.nn.sigmoid(gates[:, 1 * H:2 * H])
    g = jnp.tanh(gates[:, 2 * H:3 * H])
    o = jax.nn.sigmoid(gates[:, 3 * H:4 * H])
    c_new = f * c + i * g
    return o * jnp.tanh(c_new), c_new


if __name__ == "__main__":
    B, INPUT_SIZE, HIDDEN = 8, 16, 32

    key = jax.random.PRNGKey(0)
    kx, kh, kc, kw1, kw2, kb1, kb2 = jax.random.split(key, 7)

    x = jax.random.normal(kx, (B, INPUT_SIZE), dtype=jnp.float32)
    h = jax.random.normal(kh, (B, HIDDEN), dtype=jnp.float32)
    c = jax.random.normal(kc, (B, HIDDEN), dtype=jnp.float32)

    # Deterministic PyTorch-style init: U(-1/sqrt(H), 1/sqrt(H)).
    bound = 1.0 / (HIDDEN ** 0.5)
    w_ih = jax.random.uniform(kw1, (4 * HIDDEN, INPUT_SIZE), jnp.float32,
                              -bound, bound)
    w_hh = jax.random.uniform(kw2, (4 * HIDDEN, HIDDEN), jnp.float32,
                              -bound, bound)
    b_ih = jax.random.uniform(kb1, (4 * HIDDEN,), jnp.float32, -bound, bound)
    b_hh = jax.random.uniform(kb2, (4 * HIDDEN,), jnp.float32, -bound, bound)

    # Weight fusion / transpose done ONCE, outside the per-step forward.
    w_fused, bias, scale, offset = jax.block_until_ready(
        prepare_lstm_params(w_ih, w_hh, b_ih, b_hh))

    fwd = jax.jit(lstm_net_forward)
    h_out, c_out = fwd(x, h, c, w_fused, bias, scale, offset)
    jax.block_until_ready((h_out, c_out))

    h_ref, c_ref = _reference(x, h, c, w_ih, w_hh, b_ih, b_hh)
    assert jnp.allclose(h_out, h_ref, atol=1e-5, rtol=1e-5)
    assert jnp.allclose(c_out, c_ref, atol=1e-5, rtol=1e-5)

    print("KERNEL_OK")
</pallas_src>

<mosaic_0001>
module attributes {stable_mosaic.version = 11 : i64} {
  func.func @lstm_cell_kernel(%arg0: memref<8x48xf32, #tpu.memory_space<vmem>>, %arg1: memref<8x32xf32, #tpu.memory_space<vmem>>, %arg2: memref<48x128xf32, #tpu.memory_space<vmem>>, %arg3: memref<1x128xf32, #tpu.memory_space<vmem>>, %arg4: memref<1x128xf32, #tpu.memory_space<vmem>>, %arg5: memref<1x128xf32, #tpu.memory_space<vmem>>, %arg6: memref<8x64xf32, #tpu.memory_space<vmem>>) attributes {dimension_semantics = [], scalar_prefetch = 0 : i64, scratch_operands = 0 : i64, tpu.core_type = #tpu.core_type<tc>} {
    %c0 = arith.constant 0 : index
    %c0_0 = arith.constant 0 : index
    %0 = vector.load %arg0[%c0, %c0_0] : memref<8x48xf32, #tpu.memory_space<vmem>>, vector<8x48xf32>
    %c0_1 = arith.constant 0 : index
    %c0_2 = arith.constant 0 : index
    %1 = vector.load %arg1[%c0_1, %c0_2] : memref<8x32xf32, #tpu.memory_space<vmem>>, vector<8x32xf32>
    %c0_3 = arith.constant 0 : index
    %c0_4 = arith.constant 0 : index
    %2 = vector.load %arg2[%c0_3, %c0_4] : memref<48x128xf32, #tpu.memory_space<vmem>>, vector<48x128xf32>
    %cst = arith.constant dense<0.000000e+00> : vector<8x128xf32>
    %3 = tpu.matmul %0, %2, %cst {dimension_numbers = #tpu.dot_dimension_numbers<[1], [0], [0], [1], [0, 0, 1, 1], [], []>} : vector<8x48xf32>, vector<48x128xf32>, vector<8x128xf32> -> vector<8x128xf32>
    %c0_5 = arith.constant 0 : index
    %c0_6 = arith.constant 0 : index
    %4 = vector.load %arg3[%c0_5, %c0_6] : memref<1x128xf32, #tpu.memory_space<vmem>>, vector<1x128xf32>
    %5 = vector.broadcast %4 : vector<1x128xf32> to vector<8x128xf32>
    %6 = arith.addf %3, %5 : vector<8x128xf32>
    %c0_7 = arith.constant 0 : index
    %c0_8 = arith.constant 0 : index
    %7 = vector.load %arg4[%c0_7, %c0_8] : memref<1x128xf32, #tpu.memory_space<vmem>>, vector<1x128xf32>
    %8 = vector.broadcast %7 : vector<1x128xf32> to vector<8x128xf32>
    %9 = arith.mulf %6, %8 : vector<8x128xf32>
    %10 = math.tanh %9 : vector<8x128xf32>
    %11 = vector.broadcast %7 : vector<1x128xf32> to vector<8x128xf32>
    %12 = arith.mulf %11, %10 : vector<8x128xf32>
    %c0_9 = arith.constant 0 : index
    %c0_10 = arith.constant 0 : index
    %13 = vector.load %arg5[%c0_9, %c0_10] : memref<1x128xf32, #tpu.memory_space<vmem>>, vector<1x128xf32>
    %14 = vector.broadcast %13 : vector<1x128xf32> to vector<8x128xf32>
    %15 = arith.addf %12, %14 : vector<8x128xf32>
    %16 = vector.extract_strided_slice %15 {offsets = [0, 0], sizes = [8, 32], strides = [1, 1]} : vector<8x128xf32> to vector<8x32xf32>
    %17 = vector.extract_strided_slice %15 {offsets = [0, 32], sizes = [8, 32], strides = [1, 1]} : vector<8x128xf32> to vector<8x32xf32>
    %18 = vector.extract_strided_slice %15 {offsets = [0, 64], sizes = [8, 32], strides = [1, 1]} : vector<8x128xf32> to vector<8x32xf32>
    %19 = vector.extract_strided_slice %15 {offsets = [0, 96], sizes = [8, 32], strides = [1, 1]} : vector<8x128xf32> to vector<8x32xf32>
    %20 = arith.mulf %17, %1 : vector<8x32xf32>
    %21 = arith.mulf %16, %18 : vector<8x32xf32>
    %22 = arith.addf %20, %21 : vector<8x32xf32>
    %23 = math.tanh %22 : vector<8x32xf32>
    %24 = arith.mulf %19, %23 : vector<8x32xf32>
    %25 = tpu.concatenate %24, %22 in 1 : vector<8x32xf32>, vector<8x32xf32> -> vector<8x64xf32>
    %c0_11 = arith.constant 0 : index
    %c0_12 = arith.constant 0 : index
    %26 = vector.load %arg6[%c0_11, %c0_12] : memref<8x64xf32, #tpu.memory_space<vmem>>, vector<8x64xf32>
    tpu.vector_store %arg6[%c0_11, %c0_12], %25 {strides = array<i32>} : memref<8x64xf32, #tpu.memory_space<vmem>>, vector<8x64xf32>,
    return
  }
}

</mosaic_0001>

<bundles_post_ra>
// kernel: lstm_net_forward.1
= control target key start
LH: loop header
LB: loop body
LE: loop exit
PB: predicated region body
PF: predicated region fallthrough
CT: control target
= control target key end

     0   :  { %11 = vsyncpa [#allocation3], 0  ;;  %s249_s21 = smov [#allocation2]   ;;  %s322_s0 = inlined_call_operand.vmem [shape: f32[8,48], index: 0, kind: input, shape index: {}]   ;;  %s323_s1 = inlined_call_operand.vmem [shape: f32[8,32], index: 1, kind: input, shape index: {}]   ;;  %s324_s2 = inlined_call_operand.hbm [shape: f32[48,128], index: 2, kind: input, shape index: {}]   ;;  %s325_s3 = inlined_call_operand.vmem [shape: f32[1,128], index: 3, kind: input, shape index: {}]   ;;  %s326_s4 = inlined_call_operand.vmem [shape: f32[1,128], index: 4, kind: input, shape index: {}]   ;;  %s327_s5 = inlined_call_operand.vmem [shape: f32[1,128], index: 5, kind: input, shape index: {}]   ;;  %s328_s6 = inlined_call_operand.vmem [shape: f32[8,64], index: 6, kind: output, shape index: {}]  }
   0x1   :  { %s21_s22 = sshll.u32 %s249_s21, 4  ;;  %s225_s25 = scalar_lea.hbm %s324_s2, 768  ;;  %s22_s22 = int_to_ptr.vmem [resolvable:$true] %s21_s22 }
   0x2   :  { %p226_p0 = scmp.ne.s32.totalorder %s324_s2, %s225_s25  ;;  %p229_p1 = scmp.lt.u32.totalorder %s225_s25, %s324_s2 }
   0x4   :  { %p231_p2 = pnand %p229_p1, %p226_p0 }
   0x6   :  { %234 = shalt.err (!%p231_p2)
}
   0x7   :  { %s235_s30 = scalar_lea.vmem %s22_s22, 768  ;;  %p240_p4 = scmp.lt.s32.totalorder %s22_s22, %s22_s22 }
   0x8   :  { %p236_p3 = scmp.ne.s32.totalorder %s22_s22, %s235_s30  ;;  %p241_p5 = scmp.lt.s32.totalorder %s235_s30, %s235_s30 }
   0xa   :  { %p242_p6 = por %p241_p5, %p240_p4 }
   0xc   :  { %p243_p7 = pnand %p242_p6, %p236_p3 }
   0xe   :  { %246 = shalt.err (!%p243_p7)
}
   0xf   :  { %s250_s7 = smov 128   ;;  %s251_s8 = smov 8  }
  0x10   :  { %27 = dma.hbm_to_vmem [thread:$0]  %s324_s2, 768, %s22_s22, [#allocation3], %s250_s7, %s250_s7, %s251_s8  }
  0x11   :  { %247 = dma.done.wait [#allocation3], 768  }
  0x12   :  { %248 = vsyncadd [#allocation3], 4294966528  ;;  %v252_v0 = vmov 0.0|0.0   ;;  %vm253_vm0 = vmmov 0   ;;  %v254_v1 = vmov 0.0   ;;  %v39_v2 = vld [vmem:[#allocation2] sm:$0xff] }
  0x13   :  { %204 = vmatprep.subr.bf16.mxu0 %v252_v0  ;;  %201 = vmatprep.mubr.msk.f32.mxu0 %vm253_vm0, %v254_v1  ;;  %v40_v3 = vld [vmem:[#allocation2 + $0x8] sm:$0xff]  ;;  %v41_v4 = vld [vmem:[#allocation2 + $0x10] sm:$0xff]  ;;  %v42_v6 = vld [vmem:[#allocation2 + $0x18] sm:$0xff]  ;;  %vm52_vm1 = vcmask 392192   ;;  %s256_s19 = smov 32   ;;  %vm169_vm2 = vcmask 261120  }
  0x14   :  { %v205_v5 = vpack.c.bf16 %v40_v3, %v39_v2  ;;  %v208_v7 = vpack.c.bf16 %v42_v6, %v41_v4  ;;  %v43_v8 = vld [vmem:[#allocation2 + $0x20] sm:$0xff]  ;;  %v44_v9 = vld [vmem:[#allocation2 + $0x28] sm:$0xff]  ;;  %vm171_vm3 = vcmask 523264  }
  0x15   :  { %v211_v10 = vpack.c.bf16 %v44_v9, %v43_v8  ;;  %v37_v11 = vld [vmem:[%s322_s0] sm:$0xff]  ;;  %s255_s0 = smov 64  }
  0x16   :  { %206 = vmatpush3.bf16.msra.mxu0 %v205_v5  ;;  %v178_v12 = vld [vmem:[%s325_s3] ss:$0 sm:$0xff] }
  0x17   :  { %207 = vmatprep.subr.bf16.mxu0 %v252_v0  ;;  %v180_v14 = vld [vmem:[%s326_s4] ss:$0 sm:$0xff] }
  0x18   :  { %v181_v19 = vld [vmem:[%s327_s5] ss:$0 sm:$0xff] }
  0x19   :  { %v38_v22 = vld [vmem:[%s323_s1] sm:$0xff] }
  0x1a   :  { %209 = vmatpush3.bf16.msra.mxu0 %v208_v7 }
  0x1b   :  { %210 = vmatprep.subr.bf16.mxu0 %v252_v0 }
  0x1e   :  { %212 = vmatpush3.bf16.msra.mxu0 %v211_v10 }
  0x21   :  { %202 = vmatmul.mubr.msk.f32.vlgmr.msra.gmra.mrb[0].mxu0 %vm52_vm1, %v37_v11 }
  0xf4   :  { %v122_v13 = vpop.f32.mrb[0].mxu0 }
  0xf5   :  { %v123_v15 = vadd.f32 %v178_v12, %v122_v13  ;;  %v203_v16 = vpop.f32.mrb[1].mxu0 }
  0xf7   :  { %v133_v17 = vmul.f32 %v180_v14, %v123_v15 }
  0xf9   :  { %221 = vtanh.f32 %v133_v17 }
 0x103   :  { %v222_v18 = vpop.eup %221 }
 0x104   :  { %v135_v20 = vmul.f32 %v222_v18, %v180_v14 }
 0x106   :  { %v143_v21 = vadd.f32 %v181_v19, %v135_v20 }
 0x108   :  { %150 = vrot.lane.b32.xlu0 %v143_v21, %s255_s0 }
 0x10c   :  { %145 = vrot.lane.b32.xlu0 %v38_v22, %s256_s19 }
 0x17a   :  { %v151_v23 = vpop.permute.xlu0 %150 }
 0x17b   :  { %v153_v24 = vmul.f32 %v151_v23, %v143_v21 }
 0x17d   :  { %155 = vrot.lane.b32.xlu1 %v153_v24, %s256_s19 }
 0x17e   :  { %v146_v25 = vpop.permute.xlu0 %145 }
 0x17f   :  { %v148_v26 = vmul.f32 %v146_v25, %v143_v21 }
 0x1ef   :  { %v156_v27 = vpop.permute.xlu1 %155 }
 0x1f0   :  { %v158_v28 = vadd.f32 %v156_v27, %v148_v26 }
 0x1f2   :  { %223 = vtanh.f32 %v158_v28 }
 0x1fc   :  { %v224_v29 = vpop.eup %223 }
 0x1fd   :  { %161 = vrot.lane.b32.xlu1 %v224_v29, %s255_s0 }
 0x26f   :  { %v162_v30 = vpop.permute.xlu1 %161 }
 0x270   :  { %v164_v31 = vmul.f32 %v162_v30, %v143_v21 }
 0x272   :  { %166 = vrot.lane.b32.xlu0 %v164_v31, %s256_s19 }
 0x2e4   :  { %v167_v32 = vpop.permute.xlu0 %166 }
 0x2e5   :  { %v170_v33 = vsel %vm169_vm2, %v167_v32, %v158_v28 }
 0x2e6   :  { %172 = vst.msk [vmem:[%s328_s6] sm:$0xff] %vm171_vm3, %v170_v33 }
 0x2e7   :  { %177 = vsyncpa [#allocation3], 1 }

</bundles_post_ra>
